<compile_context>
chip_gen: v6e
topology: v6e:2x2x1
jax: 0.10.0
libtpu: 0.0.40
codegen_flags: <defaults>
</compile_context>

<pallas_src>
import functools

import jax
import jax.numpy as jnp
import numpy as np
from jax import lax
from jax.experimental import pallas as pl
from jax.experimental.pallas import tpu as pltpu


def _pick_tile(n, cap):
    """Largest divisor of n that is <= cap and a multiple of 8 (or == n)."""
    for t in range(min(n, cap), 0, -1):
        if n % t == 0 and (t % 8 == 0 or t == n):
            return t
    return n


# ----------------------------------------------------------------------------
# Kernel 1: CLIP contrastive loss (tiled, online logsumexp for rows & columns)
# ----------------------------------------------------------------------------
def _clip_loss_kernel(t_ref, i_ref, o_ref,
                      m_row, l_row, col_m, col_l, acc,
                      *, normalize, inv_temp, batch):
    qi = pl.program_id(0)
    ki = pl.program_id(1)
    nq = pl.num_programs(0)
    nk = pl.num_programs(1)

    t = t_ref[...].astype(jnp.float32)    # (Tq, D)
    im = i_ref[...].astype(jnp.float32)   # (Tk, D)

    if normalize:
        # F.normalize(p=2, dim=1) == x * rsqrt(max(sum(x^2), eps^2)); rsqrt goes
        # to the EUP slot.  1/temperature is folded into the text operand so no
        # per-logit divide is ever emitted.
        t_scale = lax.rsqrt(jnp.maximum(jnp.sum(t * t, axis=1, keepdims=True), 1e-24))
        t = t * (t_scale * inv_temp)
        i_scale = lax.rsqrt(jnp.maximum(jnp.sum(im * im, axis=1, keepdims=True), 1e-24))
        im = im * i_scale
    elif inv_temp != 1.0:
        t = t * inv_temp

    # Keep bf16 operands for the MXU when inputs are bf16; accumulate in f32.
    mm_dt = jnp.bfloat16 if t_ref.dtype == jnp.bfloat16 else jnp.float32
    # Contract the last dim of both operands directly (no explicit transpose).
    s = lax.dot_general(t.astype(mm_dt), im.astype(mm_dt),
                        dimension_numbers=(((1,), (1,)), ((), ())),
                        preferred_element_type=jnp.float32)       # (Tq, Tk)

    @pl.when(jnp.logical_and(qi == 0, ki == 0))
    def _init():
        acc[...] = jnp.zeros_like(acc)

    # ---- online row logsumexp over the key (ki) axis ----
    tile_rmax = jnp.max(s, axis=1, keepdims=True)                 # (Tq, 1)

    @pl.when(ki == 0)
    def _row_first():
        m_row[...] = tile_rmax
        l_row[...] = jnp.sum(jnp.exp(s - tile_rmax), axis=1, keepdims=True)

    @pl.when(ki > 0)
    def _row_update():
        m_old = m_row[...]
        m_new = jnp.maximum(m_old, tile_rmax)
        l_row[...] = (l_row[...] * jnp.exp(m_old - m_new)
                      + jnp.sum(jnp.exp(s - m_new), axis=1, keepdims=True))
        m_row[...] = m_new

    # ---- online column logsumexp, persisted in scratch across the qi axis ----
    tile_cmax = jnp.max(s, axis=0, keepdims=True)                 # (1, Tk)

    @pl.when(qi == 0)
    def _col_first():
        col_m[ki] = tile_cmax
        col_l[ki] = jnp.sum(jnp.exp(s - tile_cmax), axis=0, keepdims=True)

    @pl.when(qi > 0)
    def _col_update():
        m_old = col_m[ki]
        m_new = jnp.maximum(m_old, tile_cmax)
        col_l[ki] = (col_l[ki] * jnp.exp(m_old - m_new)
                     + jnp.sum(jnp.exp(s - m_new), axis=0, keepdims=True))
        col_m[ki] = m_new

    # ---- diagonal logits: exact per-row dot product (needs Tq == Tk) ----
    @pl.when(qi == ki)
    def _diag():
        acc[...] += -2.0 * jnp.sum(t * im, keepdims=True)

    # ---- finalize the row logsumexp for this query block ----
    @pl.when(ki == nk - 1)
    def _row_fin():
        acc[...] += jnp.sum(m_row[...] + jnp.log(l_row[...]), keepdims=True)

    # ---- very last step: fold in the column logsumexps and take the mean ----
    @pl.when(jnp.logical_and(qi == nq - 1, ki == nk - 1))
    def _final():
        col_total = jnp.sum(col_m[...] + jnp.log(col_l[...]))
        o_ref[...] = (acc[...] + col_total) * (1.0 / batch)


def clip_contrastive_loss(text_embed, image_embed, *, normalize=True, temperature=1.0):
    b, d = text_embed.shape
    assert image_embed.shape == (b, d)
    t_blk = _pick_tile(b, 256)        # modest sim tiles (keeps vregs/VMEM small)
    nq = nk = b // t_blk

    kernel = functools.partial(_clip_loss_kernel, normalize=normalize,
                               inv_temp=float(1.0 / temperature), batch=float(b))
    out = pl.pallas_call(
        kernel,
        out_shape=jax.ShapeDtypeStruct((1, 1), jnp.float32),
        grid=(nq, nk),
        in_specs=[pl.BlockSpec((t_blk, d), lambda qi, ki: (qi, 0)),   # text rows
                  pl.BlockSpec((t_blk, d), lambda qi, ki: (ki, 0))],  # image rows
        out_specs=pl.BlockSpec((1, 1), lambda qi, ki: (0, 0)),
        scratch_shapes=[
            pltpu.VMEM((t_blk, 1), jnp.float32),       # m_row
            pltpu.VMEM((t_blk, 1), jnp.float32),       # l_row
            pltpu.VMEM((nk, 1, t_blk), jnp.float32),   # col_m (persists across qi)
            pltpu.VMEM((nk, 1, t_blk), jnp.float32),   # col_l
            pltpu.VMEM((1, 1), jnp.float32),           # scalar accumulator
        ],
        compiler_params=pltpu.CompilerParams(
            # The column logsumexp carries state across the qi axis, so both
            # axes are "arbitrary".
            # TODO(synk): emit per-core partial column stats so qi can be
            # "parallel" and use both v7x TensorCores.
            dimension_semantics=("arbitrary", "arbitrary")),
    )(text_embed, image_embed)
    return out[0, 0]


# ----------------------------------------------------------------------------
# Kernel 2: fused (a - b) -> sum of squares, tiled with an accumulator output
# ----------------------------------------------------------------------------
def _guided_sq_kernel(a_ref, b_ref, o_ref):
    step = pl.program_id(0)
    diff = a_ref[...].astype(jnp.float32) - b_ref[...].astype(jnp.float32)
    part = jnp.sum(diff * diff, keepdims=True)        # (1, 1)

    @pl.when(step == 0)
    def _():
        o_ref[...] = part

    @pl.when(step > 0)
    def _():
        o_ref[...] += part


def _lane_dense_2d(n_elems):
    """Pick a lane-dense (rows, cols) 2-D view of a flat buffer."""
    for cols in (2048, 1024, 512, 256, 128):
        if n_elems % cols == 0:
            return n_elems // cols, cols
    return 1, n_elems   # fallback: single full-width row (block == full dims)


def guided_sq_sum(a, b):
    """sum((a - b)**2) with the subtraction fused into the kernel."""
    n = int(a.size)
    rows, cols = _lane_dense_2d(n)
    a2 = a.reshape(rows, cols)
    b2 = b.reshape(rows, cols)
    r_blk = _pick_tile(rows, 1024)
    out = pl.pallas_call(
        _guided_sq_kernel,
        out_shape=jax.ShapeDtypeStruct((1, 1), jnp.float32),
        grid=(rows // r_blk,),
        in_specs=[pl.BlockSpec((r_blk, cols), lambda i: (i, 0)),
                  pl.BlockSpec((r_blk, cols), lambda i: (i, 0))],
        out_specs=pl.BlockSpec((1, 1), lambda i: (0, 0)),
        compiler_params=pltpu.CompilerParams(dimension_semantics=("arbitrary",)),
    )(a2, b2)
    return out[0, 0]


# ----------------------------------------------------------------------------
# Module wrapper mirroring CLIPLoss.forward
# ----------------------------------------------------------------------------
class CLIPLoss:
    def __init__(self, penalty=0, normalize=True, temperature=1.0):
        self.penalty = penalty
        self.normalize = normalize
        self.temperature = temperature

    def __call__(self, inputs, targets, guide=False):
        text_input, image_input = inputs
        text_embed = text_input[0]     # (B, D)
        image_embed = image_input[0]   # (B, D)

        total_loss = clip_contrastive_loss(
            text_embed, image_embed,
            normalize=self.normalize, temperature=self.temperature)
        # Mirrors `total_loss.item()` numerically but stays a device scalar
        # (no blocking host sync; keeps the wrapper jit/grad-friendly).
        loss = total_loss

        if self.penalty != 0 and guide:
            text_in = jnp.stack(text_input[1])       # (K, B, H, W)
            image_in = jnp.stack(image_input[1])
            text_tgt = jnp.stack(targets[0])
            image_tgt = jnp.stack(targets[1])
            b = text_in.shape[1]
            # Subtraction fused into the sum-of-squares kernel (single HBM pass).
            ss = guided_sq_sum(text_in, text_tgt) + guided_sq_sum(image_in, image_tgt)
            penalty_mean = ss / b                    # == penality_term.mean()/penalty
            total_loss = total_loss + self.penalty * penalty_mean
            penality_term = penalty_mean             # device scalar, not .item()
        else:
            penality_term = 0

        return total_loss, loss, penality_term


# ----------------------------------------------------------------------------
# Pure-JAX references (correctness check)
# ----------------------------------------------------------------------------
def _ref_clip_loss(t, im, normalize=True, temperature=1.0):
    if normalize:
        t = t / jnp.maximum(jnp.linalg.norm(t, axis=1, keepdims=True), 1e-12)
        im = im / jnp.maximum(jnp.linalg.norm(im, axis=1, keepdims=True), 1e-12)
    sim = jnp.exp(t @ im.T / temperature)
    diag = jnp.diag(sim)
    lti = diag / jnp.sum(sim, axis=1)
    lit = diag / jnp.sum(sim, axis=0)
    return jnp.mean(-jnp.log(lti) - jnp.log(lit))


if __name__ == "__main__":
    key = jax.random.PRNGKey(0)
    k1, k2, k3, k4, k5, k6 = jax.random.split(key, 6)

    B, D = 8, 32
    K, H, W = 2, 4, 4

    text_embed = jax.random.normal(k1, (B, D), dtype=jnp.float32)
    image_embed = jax.random.normal(k2, (B, D), dtype=jnp.float32)

    # guided features: lists of (B, H, W) tensors (stacked to (K, B, H, W))
    text_guided_in = [jax.random.normal(k3, (B, H, W), dtype=jnp.float32) for _ in range(K)]
    image_guided_in = [jax.random.normal(k4, (B, H, W), dtype=jnp.float32) for _ in range(K)]
    text_guided_tgt = [jax.random.normal(k5, (B, H, W), dtype=jnp.float32) for _ in range(K)]
    image_guided_tgt = [jax.random.normal(k6, (B, H, W), dtype=jnp.float32) for _ in range(K)]

    inputs = ((text_embed, text_guided_in), (image_embed, image_guided_in))
    targets = (text_guided_tgt, image_guided_tgt)

    # default path (penalty=0, guide=False)
    loss_fn = CLIPLoss(penalty=0, normalize=True, temperature=1.0)
    total_loss, loss, pen = loss_fn(inputs, targets, guide=False)
    jax.block_until_ready(total_loss)

    # guided/penalty path
    loss_fn_pen = CLIPLoss(penalty=0.1, normalize=True, temperature=1.0)
    total_loss_p, loss_p, pen_p = loss_fn_pen(inputs, targets, guide=True)
    jax.block_until_ready(total_loss_p)

    # correctness check against a pure-JAX reference
    ref_loss = _ref_clip_loss(text_embed, image_embed, normalize=True, temperature=1.0)
    tdiff = jnp.stack(text_guided_in) - jnp.stack(text_guided_tgt)
    idiff = jnp.stack(image_guided_in) - jnp.stack(image_guided_tgt)
    ref_pen = (jnp.sum(tdiff * tdiff) + jnp.sum(idiff * idiff)) / B
    ref_total_p = ref_loss + 0.1 * ref_pen

    np.testing.assert_allclose(np.asarray(total_loss), np.asarray(ref_loss),
                               rtol=1e-4, atol=1e-5)
    np.testing.assert_allclose(np.asarray(pen_p), np.asarray(ref_pen),
                               rtol=1e-4, atol=1e-5)
    np.testing.assert_allclose(np.asarray(total_loss_p), np.asarray(ref_total_p),
                               rtol=1e-4, atol=1e-5)

    print("KERNEL_OK")
</pallas_src>

<mosaic_0001>
module attributes {stable_mosaic.version = 11 : i64} {
  func.func @_clip_loss_kernel(%arg0: i32, %arg1: i32, %arg2: memref<8x32xf32, #tpu.memory_space<vmem>>, %arg3: memref<8x32xf32, #tpu.memory_space<vmem>>, %arg4: memref<1x1xf32, #tpu.memory_space<vmem>>, %arg5: memref<8x1xf32, #tpu.memory_space<vmem>>, %arg6: memref<8x1xf32, #tpu.memory_space<vmem>>, %arg7: memref<1x1x8xf32, #tpu.memory_space<vmem>>, %arg8: memref<1x1x8xf32, #tpu.memory_space<vmem>>, %arg9: memref<1x1xf32, #tpu.memory_space<vmem>>) attributes {dimension_semantics = [#tpu.dimension_semantics<arbitrary>, #tpu.dimension_semantics<arbitrary>], iteration_bounds = array<i64: 1, 1>, scalar_prefetch = 0 : i64, scratch_operands = 5 : i64, tpu.core_type = #tpu.core_type<tc>, window_params = [{transform_indices = @transform_0, window_bounds = array<i64: 8, 32>}, {transform_indices = @transform_1, window_bounds = array<i64: 8, 32>}, {pipeline_mode = #tpu.pipeline_mode<synchronous>, transform_indices = @transform_2, window_bounds = array<i64: 1, 1>}]} {
    %c0 = arith.constant 0 : index
    %c0_0 = arith.constant 0 : index
    %0 = vector.load %arg2[%c0, %c0_0] : memref<8x32xf32, #tpu.memory_space<vmem>>, vector<8x32xf32>
    %c0_1 = arith.constant 0 : index
    %c0_2 = arith.constant 0 : index
    %1 = vector.load %arg3[%c0_1, %c0_2] : memref<8x32xf32, #tpu.memory_space<vmem>>, vector<8x32xf32>
    %2 = arith.mulf %0, %0 : vector<8x32xf32>
    %cst = arith.constant dense<0.000000e+00> : vector<8xf32>
    %3 = vector.multi_reduction <add>, %2, %cst [1] : vector<8x32xf32> to vector<8xf32>
    %4 = vector.shape_cast %3 : vector<8xf32> to vector<8x1xf32>
    %cst_3 = arith.constant 1.000000e-24 : f32
    %5 = vector.broadcast %cst_3 : f32 to vector<8x1xf32>
    %6 = arith.maximumf %4, %5 : vector<8x1xf32>
    %7 = math.rsqrt %6 : vector<8x1xf32>
    %cst_4 = arith.constant 1.000000e+00 : f32
    %8 = vector.broadcast %cst_4 : f32 to vector<8x1xf32>
    %9 = arith.mulf %7, %8 : vector<8x1xf32>
    %10 = vector.broadcast %9 : vector<8x1xf32> to vector<8x32xf32>
    %11 = arith.mulf %0, %10 : vector<8x32xf32>
    %12 = arith.mulf %1, %1 : vector<8x32xf32>
    %cst_5 = arith.constant dense<0.000000e+00> : vector<8xf32>
    %13 = vector.multi_reduction <add>, %12, %cst_5 [1] : vector<8x32xf32> to vector<8xf32>
    %14 = vector.shape_cast %13 : vector<8xf32> to vector<8x1xf32>
    %cst_6 = arith.constant 1.000000e-24 : f32
    %15 = vector.broadcast %cst_6 : f32 to vector<8x1xf32>
    %16 = arith.maximumf %14, %15 : vector<8x1xf32>
    %17 = math.rsqrt %16 : vector<8x1xf32>
    %18 = vector.broadcast %17 : vector<8x1xf32> to vector<8x32xf32>
    %19 = arith.mulf %1, %18 : vector<8x32xf32>
    %cst_7 = arith.constant dense<0.000000e+00> : vector<8x8xf32>
    %20 = tpu.matmul %11, %19, %cst_7 {dimension_numbers = #tpu.dot_dimension_numbers<[1], [1], [0], [0], [0, 0, 1, 0], [], []>} : vector<8x32xf32>, vector<8x32xf32>, vector<8x8xf32> -> vector<8x8xf32>
    %c0_i32 = arith.constant 0 : i32
    %21 = arith.cmpi eq, %arg0, %c0_i32 : i32
    %c0_i32_8 = arith.constant 0 : i32
    %22 = arith.cmpi eq, %arg1, %c0_i32_8 : i32
    %23 = arith.andi %21, %22 : i1
    %24 = arith.extui %23 : i1 to i32
    %c0_i32_9 = arith.constant 0 : i32
    %25 = arith.cmpi ne, %24, %c0_i32_9 : i32
    scf.if %25 {
      %cst_26 = arith.constant 0.000000e+00 : f32
      %53 = vector.broadcast %cst_26 : f32 to vector<1x1xf32>
      %c0_27 = arith.constant 0 : index
      %c0_28 = arith.constant 0 : index
      %54 = vector.load %arg9[%c0_27, %c0_28] : memref<1x1xf32, #tpu.memory_space<vmem>>, vector<1x1xf32>
      tpu.vector_store %arg9[%c0_27, %c0_28], %53 {strides = array<i32>} : memref<1x1xf32, #tpu.memory_space<vmem>>, vector<1x1xf32>,
    } else {
    }
    %cst_10 = arith.constant dense<0xFF800000> : vector<8xf32>
    %26 = vector.multi_reduction <maximumf>, %20, %cst_10 [1] : vector<8x8xf32> to vector<8xf32>
    %27 = vector.shape_cast %26 : vector<8xf32> to vector<8x1xf32>
    %c0_i32_11 = arith.constant 0 : i32
    %28 = arith.cmpi eq, %arg1, %c0_i32_11 : i32
    %29 = arith.extui %28 : i1 to i32
    %c0_i32_12 = arith.constant 0 : i32
    %30 = arith.cmpi ne, %29, %c0_i32_12 : i32
    scf.if %30 {
      %c0_26 = arith.constant 0 : index
      %c0_27 = arith.constant 0 : index
      %53 = vector.load %arg5[%c0_26, %c0_27] : memref<8x1xf32, #tpu.memory_space<vmem>>, vector<8x1xf32>
      tpu.vector_store %arg5[%c0_26, %c0_27], %27 {strides = array<i32>} : memref<8x1xf32, #tpu.memory_space<vmem>>, vector<8x1xf32>,
      %54 = vector.broadcast %27 : vector<8x1xf32> to vector<8x8xf32>
      %55 = arith.subf %20, %54 : vector<8x8xf32>
      %56 = math.exp %55 : vector<8x8xf32>
      %cst_28 = arith.constant dense<0.000000e+00> : vector<8xf32>
      %57 = vector.multi_reduction <add>, %56, %cst_28 [1] : vector<8x8xf32> to vector<8xf32>
      %58 = vector.shape_cast %57 : vector<8xf32> to vector<8x1xf32>
      %c0_29 = arith.constant 0 : index
      %c0_30 = arith.constant 0 : index
      %59 = vector.load %arg6[%c0_29, %c0_30] : memref<8x1xf32, #tpu.memory_space<vmem>>, vector<8x1xf32>
      tpu.vector_store %arg6[%c0_29, %c0_30], %58 {strides = array<i32>} : memref<8x1xf32, #tpu.memory_space<vmem>>, vector<8x1xf32>,
    } else {
    }
    %c0_i32_13 = arith.constant 0 : i32
    %31 = arith.cmpi sgt, %arg1, %c0_i32_13 : i32
    %32 = arith.extui %31 : i1 to i32
    %c0_i32_14 = arith.constant 0 : i32
    %33 = arith.cmpi ne, %32, %c0_i32_14 : i32
    scf.if %33 {
      %c0_26 = arith.constant 0 : index
      %c0_27 = arith.constant 0 : index
      %53 = vector.load %arg5[%c0_26, %c0_27] : memref<8x1xf32, #tpu.memory_space<vmem>>, vector<8x1xf32>
      %54 = arith.maximumf %53, %27 : vector<8x1xf32>
      %c0_28 = arith.constant 0 : index
      %c0_29 = arith.constant 0 : index
      %55 = vector.load %arg6[%c0_28, %c0_29] : memref<8x1xf32, #tpu.memory_space<vmem>>, vector<8x1xf32>
      %56 = arith.subf %53, %54 : vector<8x1xf32>
      %57 = math.exp %56 : vector<8x1xf32>
      %58 = arith.mulf %55, %57 : vector<8x1xf32>
      %59 = vector.broadcast %54 : vector<8x1xf32> to vector<8x8xf32>
      %60 = arith.subf %20, %59 : vector<8x8xf32>
      %61 = math.exp %60 : vector<8x8xf32>
      %cst_30 = arith.constant dense<0.000000e+00> : vector<8xf32>
      %62 = vector.multi_reduction <add>, %61, %cst_30 [1] : vector<8x8xf32> to vector<8xf32>
      %63 = vector.shape_cast %62 : vector<8xf32> to vector<8x1xf32>
      %64 = arith.addf %58, %63 : vector<8x1xf32>
      %c0_31 = arith.constant 0 : index
      %c0_32 = arith.constant 0 : index
      %65 = vector.load %arg6[%c0_31, %c0_32] : memref<8x1xf32, #tpu.memory_space<vmem>>, vector<8x1xf32>
      tpu.vector_store %arg6[%c0_31, %c0_32], %64 {strides = array<i32>} : memref<8x1xf32, #tpu.memory_space<vmem>>, vector<8x1xf32>,
      %c0_33 = arith.constant 0 : index
      %c0_34 = arith.constant 0 : index
      %66 = vector.load %arg5[%c0_33, %c0_34] : memref<8x1xf32, #tpu.memory_space<vmem>>, vector<8x1xf32>
      tpu.vector_store %arg5[%c0_33, %c0_34], %54 {strides = array<i32>} : memref<8x1xf32, #tpu.memory_space<vmem>>, vector<8x1xf32>,
    } else {
    }
    %cst_15 = arith.constant dense<0xFF800000> : vector<8xf32>
    %34 = vector.multi_reduction <maximumf>, %20, %cst_15 [0] : vector<8x8xf32> to vector<8xf32>
    %35 = vector.shape_cast %34 : vector<8xf32> to vector<1x8xf32>
    %c0_i32_16 = arith.constant 0 : i32
    %36 = arith.cmpi eq, %arg0, %c0_i32_16 : i32
    %37 = arith.extui %36 : i1 to i32
    %c0_i32_17 = arith.constant 0 : i32
    %38 = arith.cmpi ne, %37, %c0_i32_17 : i32
    scf.if %38 {
      %53 = arith.index_cast %arg1 : i32 to index
      %c0_26 = arith.constant 0 : index
      %c0_27 = arith.constant 0 : index
      %54 = vector.load %arg7[%53, %c0_26, %c0_27] : memref<1x1x8xf32, #tpu.memory_space<vmem>>, vector<1x1x8xf32>
      %55 = vector.shape_cast %54 : vector<1x1x8xf32> to vector<1x8xf32>
      %56 = vector.shape_cast %35 : vector<1x8xf32> to vector<1x1x8xf32>
      tpu.vector_store %arg7[%53, %c0_26, %c0_27], %56 {strides = array<i32>} : memref<1x1x8xf32, #tpu.memory_space<vmem>>, vector<1x1x8xf32>,
      %57 = vector.broadcast %35 : vector<1x8xf32> to vector<8x8xf32>
      %58 = arith.subf %20, %57 : vector<8x8xf32>
      %59 = math.exp %58 : vector<8x8xf32>
      %cst_28 = arith.constant dense<0.000000e+00> : vector<8xf32>
      %60 = vector.multi_reduction <add>, %59, %cst_28 [0] : vector<8x8xf32> to vector<8xf32>
      %61 = vector.shape_cast %60 : vector<8xf32> to vector<1x8xf32>
      %62 = arith.index_cast %arg1 : i32 to index
      %c0_29 = arith.constant 0 : index
      %c0_30 = arith.constant 0 : index
      %63 = vector.load %arg8[%62, %c0_29, %c0_30] : memref<1x1x8xf32, #tpu.memory_space<vmem>>, vector<1x1x8xf32>
      %64 = vector.shape_cast %63 : vector<1x1x8xf32> to vector<1x8xf32>
      %65 = vector.shape_cast %61 : vector<1x8xf32> to vector<1x1x8xf32>
      tpu.vector_store %arg8[%62, %c0_29, %c0_30], %65 {strides = array<i32>} : memref<1x1x8xf32, #tpu.memory_space<vmem>>, vector<1x1x8xf32>,
    } else {
    }
    %c0_i32_18 = arith.constant 0 : i32
    %39 = arith.cmpi sgt, %arg0, %c0_i32_18 : i32
    %40 = arith.extui %39 : i1 to i32
    %c0_i32_19 = arith.constant 0 : i32
    %41 = arith.cmpi ne, %40, %c0_i32_19 : i32
    scf.if %41 {
      %53 = arith.index_cast %arg1 : i32 to index
      %c0_26 = arith.constant 0 : index
      %c0_27 = arith.constant 0 : index
      %54 = vector.load %arg7[%53, %c0_26, %c0_27] : memref<1x1x8xf32, #tpu.memory_space<vmem>>, vector<1x1x8xf32>
      %55 = vector.shape_cast %54 : vector<1x1x8xf32> to vector<1x8xf32>
      %56 = arith.maximumf %55, %35 : vector<1x8xf32>
      %57 = arith.index_cast %arg1 : i32 to index
      %c0_28 = arith.constant 0 : index
      %c0_29 = arith.constant 0 : index
      %58 = vector.load %arg8[%57, %c0_28, %c0_29] : memref<1x1x8xf32, #tpu.memory_space<vmem>>, vector<1x1x8xf32>
      %59 = vector.shape_cast %58 : vector<1x1x8xf32> to vector<1x8xf32>
      %60 = arith.subf %55, %56 : vector<1x8xf32>
      %61 = math.exp %60 : vector<1x8xf32>
      %62 = arith.mulf %59, %61 : vector<1x8xf32>
      %63 = vector.broadcast %56 : vector<1x8xf32> to vector<8x8xf32>
      %64 = arith.subf %20, %63 : vector<8x8xf32>
      %65 = math.exp %64 : vector<8x8xf32>
      %cst_30 = arith.constant dense<0.000000e+00> : vector<8xf32>
      %66 = vector.multi_reduction <add>, %65, %cst_30 [0] : vector<8x8xf32> to vector<8xf32>
      %67 = vector.shape_cast %66 : vector<8xf32> to vector<1x8xf32>
      %68 = arith.addf %62, %67 : vector<1x8xf32>
      %69 = arith.index_cast %arg1 : i32 to index
      %c0_31 = arith.constant 0 : index
      %c0_32 = arith.constant 0 : index
      %70 = vector.load %arg8[%69, %c0_31, %c0_32] : memref<1x1x8xf32, #tpu.memory_space<vmem>>, vector<1x1x8xf32>
      %71 = vector.shape_cast %70 : vector<1x1x8xf32> to vector<1x8xf32>
      %72 = vector.shape_cast %68 : vector<1x8xf32> to vector<1x1x8xf32>
      tpu.vector_store %arg8[%69, %c0_31, %c0_32], %72 {strides = array<i32>} : memref<1x1x8xf32, #tpu.memory_space<vmem>>, vector<1x1x8xf32>,
      %73 = arith.index_cast %arg1 : i32 to index
      %c0_33 = arith.constant 0 : index
      %c0_34 = arith.constant 0 : index
      %74 = vector.load %arg7[%73, %c0_33, %c0_34] : memref<1x1x8xf32, #tpu.memory_space<vmem>>, vector<1x1x8xf32>
      %75 = vector.shape_cast %74 : vector<1x1x8xf32> to vector<1x8xf32>
      %76 = vector.shape_cast %56 : vector<1x8xf32> to vector<1x1x8xf32>
      tpu.vector_store %arg7[%73, %c0_33, %c0_34], %76 {strides = array<i32>} : memref<1x1x8xf32, #tpu.memory_space<vmem>>, vector<1x1x8xf32>,
    } else {
    }
    %42 = arith.cmpi eq, %arg0, %arg1 : i32
    %43 = arith.extui %42 : i1 to i32
    %c0_i32_20 = arith.constant 0 : i32
    %44 = arith.cmpi ne, %43, %c0_i32_20 : i32
    scf.if %44 {
      %c0_26 = arith.constant 0 : index
      %c0_27 = arith.constant 0 : index
      %53 = vector.load %arg9[%c0_26, %c0_27] : memref<1x1xf32, #tpu.memory_space<vmem>>, vector<1x1xf32>
      %54 = arith.mulf %11, %19 : vector<8x32xf32>
      %55 = vector.shape_cast %54 : vector<8x32xf32> to vector<1x8x32xf32>
      %cst_28 = arith.constant dense<0.000000e+00> : vector<1xf32>
      %56 = vector.multi_reduction <add>, %55, %cst_28 [1, 2] : vector<1x8x32xf32> to vector<1xf32>
      %57 = vector.shape_cast %56 : vector<1xf32> to vector<1x1x1xf32>
      %58 = vector.extract %57[0, 0, 0] : f32 from vector<1x1x1xf32>
      %59 = vector.broadcast %58 : f32 to vector<1x1xf32>
      %cst_29 = arith.constant -2.000000e+00 : f32
      %60 = vector.broadcast %cst_29 : f32 to vector<1x1xf32>
      %61 = arith.mulf %60, %59 : vector<1x1xf32>
      %62 = arith.addf %53, %61 : vector<1x1xf32>
      %c0_30 = arith.constant 0 : index
      %c0_31 = arith.constant 0 : index
      %63 = vector.load %arg9[%c0_30, %c0_31] : memref<1x1xf32, #tpu.memory_space<vmem>>, vector<1x1xf32>
      tpu.vector_store %arg9[%c0_30, %c0_31], %62 {strides = array<i32>} : memref<1x1xf32, #tpu.memory_space<vmem>>, vector<1x1xf32>,
    } else {
    }
    %c0_i32_21 = arith.constant 0 : i32
    %45 = arith.cmpi eq, %arg1, %c0_i32_21 : i32
    %46 = arith.extui %45 : i1 to i32
    %c0_i32_22 = arith.constant 0 : i32
    %47 = arith.cmpi ne, %46, %c0_i32_22 : i32
    scf.if %47 {
      %c0_26 = arith.constant 0 : index
      %c0_27 = arith.constant 0 : index
      %53 = vector.load %arg9[%c0_26, %c0_27] : memref<1x1xf32, #tpu.memory_space<vmem>>, vector<1x1xf32>
      %c0_28 = arith.constant 0 : index
      %c0_29 = arith.constant 0 : index
      %54 = vector.load %arg5[%c0_28, %c0_29] : memref<8x1xf32, #tpu.memory_space<vmem>>, vector<8x1xf32>
      %c0_30 = arith.constant 0 : index
      %c0_31 = arith.constant 0 : index
      %55 = vector.load %arg6[%c0_30, %c0_31] : memref<8x1xf32, #tpu.memory_space<vmem>>, vector<8x1xf32>
      %56 = math.log %55 : vector<8x1xf32>
      %57 = arith.addf %54, %56 : vector<8x1xf32>
      %58 = vector.shape_cast %57 : vector<8x1xf32> to vector<1x8x1xf32>
      %cst_32 = arith.constant dense<0.000000e+00> : vector<1xf32>
      %59 = vector.multi_reduction <add>, %58, %cst_32 [1, 2] : vector<1x8x1xf32> to vector<1xf32>
      %60 = vector.shape_cast %59 : vector<1xf32> to vector<1x1x1xf32>
      %61 = vector.extract %60[0, 0, 0] : f32 from vector<1x1x1xf32>
      %62 = vector.broadcast %61 : f32 to vector<1x1xf32>
      %63 = arith.addf %53, %62 : vector<1x1xf32>
      %c0_33 = arith.constant 0 : index
      %c0_34 = arith.constant 0 : index
      %64 = vector.load %arg9[%c0_33, %c0_34] : memref<1x1xf32, #tpu.memory_space<vmem>>, vector<1x1xf32>
      tpu.vector_store %arg9[%c0_33, %c0_34], %63 {strides = array<i32>} : memref<1x1xf32, #tpu.memory_space<vmem>>, vector<1x1xf32>,
    } else {
    }
    %c0_i32_23 = arith.constant 0 : i32
    %48 = arith.cmpi eq, %arg0, %c0_i32_23 : i32
    %c0_i32_24 = arith.constant 0 : i32
    %49 = arith.cmpi eq, %arg1, %c0_i32_24 : i32
    %50 = arith.andi %48, %49 : i1
    %51 = arith.extui %50 : i1 to i32
    %c0_i32_25 = arith.constant 0 : i32
    %52 = arith.cmpi ne, %51, %c0_i32_25 : i32
    scf.if %52 {
      %c0_26 = arith.constant 0 : index
      %c0_27 = arith.constant 0 : index
      %c0_28 = arith.constant 0 : index
      %53 = vector.load %arg7[%c0_26, %c0_27, %c0_28] : memref<1x1x8xf32, #tpu.memory_space<vmem>>, vector<1x1x8xf32>
      %c0_29 = arith.constant 0 : index
      %c0_30 = arith.constant 0 : index
      %c0_31 = arith.constant 0 : index
      %54 = vector.load %arg8[%c0_29, %c0_30, %c0_31] : memref<1x1x8xf32, #tpu.memory_space<vmem>>, vector<1x1x8xf32>
      %55 = math.log %54 : vector<1x1x8xf32>
      %56 = arith.addf %53, %55 : vector<1x1x8xf32>
      %57 = vector.shape_cast %56 : vector<1x1x8xf32> to vector<1x1x1x8xf32>
      %cst_32 = arith.constant dense<0.000000e+00> : vector<1xf32>
      %58 = vector.multi_reduction <add>, %57, %cst_32 [1, 2, 3] : vector<1x1x1x8xf32> to vector<1xf32>
      %59 = vector.shape_cast %58 : vector<1xf32> to vector<1x1x1x1xf32>
      %60 = vector.extract %59[0, 0, 0, 0] : f32 from vector<1x1x1x1xf32>
      %c0_33 = arith.constant 0 : index
      %c0_34 = arith.constant 0 : index
      %61 = vector.load %arg9[%c0_33, %c0_34] : memref<1x1xf32, #tpu.memory_space<vmem>>, vector<1x1xf32>
      %62 = vector.broadcast %60 : f32 to vector<1x1xf32>
      %63 = arith.addf %61, %62 : vector<1x1xf32>
      %cst_35 = arith.constant 1.250000e-01 : f32
      %64 = vector.broadcast %cst_35 : f32 to vector<1x1xf32>
      %65 = arith.mulf %63, %64 : vector<1x1xf32>
      %c0_36 = arith.constant 0 : index
      %c0_37 = arith.constant 0 : index
      %66 = vector.load %arg4[%c0_36, %c0_37] : memref<1x1xf32, #tpu.memory_space<vmem>>, vector<1x1xf32>
      tpu.vector_store %arg4[%c0_36, %c0_37], %65 {strides = array<i32>} : memref<1x1xf32, #tpu.memory_space<vmem>>, vector<1x1xf32>,
    } else {
    }
    return
  }
  func.func @transform_0(%arg0: i32, %arg1: i32) -> (i32, i32) {
    %c0_i32 = arith.constant 0 : i32
    %c0_i32_0 = arith.constant 0 : i32
    return %arg0, %c0_i32 : i32, i32
  }
  func.func @transform_1(%arg0: i32, %arg1: i32) -> (i32, i32) {
    %c0_i32 = arith.constant 0 : i32
    %c0_i32_0 = arith.constant 0 : i32
    return %arg1, %c0_i32 : i32, i32
  }
  func.func @transform_2(%arg0: i32, %arg1: i32) -> (i32, i32) {
    %c0_i32 = arith.constant 0 : i32
    %c0_i32_0 = arith.constant 0 : i32
    %c0_i32_1 = arith.constant 0 : i32
    return %c0_i32, %c0_i32_0 : i32, i32
  }
}

</mosaic_0001>

<bundles_post_ra>
// kernel: tpu_custom_call.1
= control target key start
LH: loop header
LB: loop body
LE: loop exit
PB: predicated region body
PF: predicated region fallthrough
CT: control target
= control target key end

     0   :  { %7 = vsyncpa [#allocation8], 0  ;;  %s462_s0 = inlined_call_operand.hbm [shape: f32[8,32], index: 0, kind: input, shape index: {}]   ;;  %s463_s1 = inlined_call_operand.hbm [shape: f32[8,32], index: 1, kind: input, shape index: {}]   ;;  %s464_s2 = inlined_call_operand.hbm [shape: f32[1,1], index: 2, kind: output, shape index: {}]  }
   0x1   :  { %8 = vsyncpa [#allocation11], 0 }
   0x2   :  { %9 = vsyncpa [#allocation9], 0  ;;  %s415_s9 = smov [#allocation7]   ;;  %s416_s11 = smov [#allocation10]  }
   0x3   :  { %s16_s10 = sshll.u32 %s415_s9, 4  ;;  %s26_s12 = sshll.u32 %s416_s11, 4  ;;  %s17_s10 = int_to_ptr.vmem [resolvable:$true] %s16_s10  ;;  %s27_s12 = int_to_ptr.vmem [resolvable:$true] %s26_s12 }
   0x4   :  { %s357_s13 = scalar_lea.vmem %s17_s10, 128  ;;  %p362_p1 = scmp.lt.s32.totalorder %s17_s10, %s17_s10 }
   0x5   :  { %p358_p0 = scmp.ne.s32.totalorder %s17_s10, %s357_s13  ;;  %p363_p2 = scmp.lt.s32.totalorder %s357_s13, %s357_s13 }
   0x7   :  { %p364_p3 = por %p363_p2, %p362_p1 }
   0x9   :  { %p365_p4 = pnand %p364_p3, %p358_p0 }
   0xb   :  { %368 = shalt.err (!%p365_p4)
}
   0xc   :  { %19 = dma.hbm_to_vmem [thread:$0]  %s462_s0, 128, %s17_s10, [#allocation8]  }
   0xd   :  { %s377_s16 = scalar_lea.vmem %s27_s12, 128  ;;  %p382_p6 = scmp.lt.s32.totalorder %s27_s12, %s27_s12 }
   0xe   :  { %p378_p5 = scmp.ne.s32.totalorder %s27_s12, %s377_s16  ;;  %p383_p7 = scmp.lt.s32.totalorder %s377_s16, %s377_s16 }
  0x10   :  { %p384_p8 = por %p383_p7, %p382_p6 }
  0x12   :  { %p385_p9 = pnand %p384_p8, %p378_p5 }
  0x14   :  { %388 = shalt.err (!%p385_p9)
}
  0x15   :  { %29 = dma.hbm_to_vmem [thread:$0]  %s463_s1, 128, %s27_s12, [#allocation11]  }
  0x16   :  { %409 = dma.done.wait [#allocation8], 128  }
  0x17   :  { %410 = vsyncadd [#allocation8], 4294967168 }
  0x18   :  { %411 = dma.done.wait [#allocation11], 128  }
  0x19   :  { %412 = vsyncadd [#allocation11], 4294967168  ;;  %v37_v0 = vld [vmem:[#allocation10] sm:$0xff]  ;;  %vm39_vm0 = vcmask 261120   ;;  %v36_v1 = vld [vmem:[#allocation7] sm:$0xff]  ;;  %vm135_vm1 = vcmask 0  }
  0x1a   :  { %v46_v2 = vmul.f32 %v37_v0, %v37_v0  ;;  %v38_v3 = vmul.f32 %v36_v1, %v36_v1  ;;  %v417_v6 = vmov 0.0   ;;  %vm418_vm2 = vmmov 0   ;;  %s419_s20 = smov [#allocation12]  }
  0x1b   :  { %321 = vmatprep.subr.mxu0 %v417_v6  ;;  %136 = vst.msk [vmem:[#allocation6] sm:$0x1] %vm135_vm1, %v417_v6  ;;  %323 = vmatprep.mubr.msk.f32.mxu0 %vm418_vm2, %v417_v6  ;;  %vm137_vm3 = vcmask 64512   ;;  %vm188_vm4 = vcmask 57344   ;;  %vm144_vm5 = vcmask 7168   ;;  %s307_s21 = sshll.u32 %s419_s20, 4  ;;  %s308_s21 = int_to_ptr.vmem [resolvable:$true] %s307_s21 }
  0x1c   :  { %v47_v4 = vsel %vm39_vm0, %v46_v2, 0.0  ;;  %v40_v5 = vsel %vm39_vm0, %v38_v3, 0.0  ;;  %s389_s22 = scalar_lea.vmem %s308_s21, 16  ;;  %s393_s23 = scalar_lea.vmem %s308_s21, 32 }
  0x1d   :  { %48 = vadd.xlane.f32.xlu0 %v47_v4  ;;  %p390_p10 = scmp.ne.s32.totalorder %s308_s21, %s389_s22  ;;  %p394_p11 = scmp.lt.s32.totalorder %s308_s21, %s308_s21 }
  0x1e   :  { %p395_p12 = scmp.lt.s32.totalorder %s393_s23, %s389_s22 }
  0x20   :  { %p396_p13 = por %p395_p12, %p394_p11 }
  0x21   :  { %41 = vadd.xlane.f32.xlu0 %v40_v5 }
  0x22   :  { %v236_v32 = vld [vmem:[#allocation6] sm:$0x1]  ;;  %p397_p0 = pnand %p396_p13, %p390_p10 }
  0xa6   :  { %v49_v7 = vpop.xlane.xlu0 %48 }
  0xa7   :  { %v50_v8 = vmax.f32 %v49_v7, 1e-24 }
  0xa9   :  { %337 = vrsqrt.f32 %v50_v8 }
  0xaa   :  { %v42_v9 = vpop.xlane.xlu0 %41 }
  0xab   :  { %v43_v10 = vmax.f32 %v42_v9, 1e-24 }
  0xad   :  { %339 = vrsqrt.f32 %v43_v10 }
  0xb6   :  { %v338_v11 = vpop.eup %337 }
  0xb7   :  { %v52_v12 = vmul.f32 %v338_v11, %v37_v0 }
  0xb9   :  { %322 = vmatpush3.xpose.msk.msra.mxu0 %vm39_vm0, %v52_v12 }
  0xba   :  { %v340_v13 = vpop.eup %339 }
  0xbb   :  { %v45_v14 = vmul.f32 %v340_v13, %v36_v1 }
  0xbd   :  { %324 = vmatmul.mubr.msk.f32.vlgmr.msra.gmra.mxu0 %vm39_vm0, %v45_v14  ;;  %v237_v15 = vmul.f32 %v52_v12, %v45_v14 }
  0xbf   :  { %v238_v16 = vsel %vm39_vm0, %v237_v15, 0.0 }
  0xc0   :  { %239 = vadd.xlane.f32.xlu0 %v238_v16 }
 0x149   :  { %v240_v17 = vpop.xlane.xlu0 %239 }
 0x14a   :  { %v241_v18 = vrot.slane %v240_v17, 4 }
 0x14c   :  { %v242_v19 = vadd.f32 %v241_v18, %v240_v17 }
 0x14e   :  { %v243_v20 = vrot.slane %v242_v19, 2 }
 0x150   :  { %v244_v21 = vadd.f32 %v243_v20, %v242_v19 }
 0x152   :  { %v245_v22 = vrot.slane %v244_v21, 1 }
 0x154   :  { %v246_v23 = vadd.f32 %v245_v22, %v244_v21 }
 0x156   :  { %326 = vpush %v246_v23 }
 0x17d   :  { %v125_v24 = vpop.f32.mrf.mxu0 }
 0x17e   :  { %v138_v25 = vsel %vm137_vm3, %v125_v24, -inf }
 0x17f   :  { %139 = vmax.xlane.f32.xlu1 %v138_v25  ;;  %v179_v26 = vrot.slane %v138_v25, 4  ;;  %v325_v27 = vpop.f32.mrf.mxu0 }
 0x181   :  { %v180_v28 = vmax.f32 %v138_v25, %v179_v26 }
 0x183   :  { %v181_v29 = vrot.slane %v180_v28, 2 }
 0x185   :  { %v182_v30 = vmax.f32 %v180_v28, %v181_v29 }
 0x187   :  { %v183_v31 = vrot.slane %v182_v30, 1  ;;  %s327_s0 = spop %326 }
 0x188   :  { %v248_v33 = vstv %s327_s0 }
 0x189   :  { %v184_v34 = vmax.f32 %v182_v30, %v183_v31  ;;  %v249_v35 = vmul.f32 -2.0, %v248_v33 }
 0x18b   :  { %v190_v36 = vsub.f32 %v125_v24, %v184_v34  ;;  %v250_v37 = vadd.f32 %v249_v35, %v236_v32  ;;  %189 = vst.msk [vmem:[#allocation4] sm:$0x1] %vm188_vm4, %v184_v34 }
 0x18d   :  { %v191_v38 = vmul.f32 1.442695, %v190_v36  ;;  %252 = vst.msk [vmem:[#allocation6] sm:$0x1] %vm135_vm1, %v250_v37 }
 0x18f   :  { %341 = vpow2.f32 %v191_v38 }
 0x192   :  { %v279_v50 = vld [vmem:[#allocation4] sm:$0x1] }
 0x194   :  { %v256_v15 = vld [vmem:[#allocation6] sm:$0x1] }
 0x19c   :  { %v342_v39 = vpop.eup %341 }
 0x19d   :  { %v193_v40 = vsel %vm137_vm3, %v342_v39, 0.0 }
 0x19e   :  { %v194_v41 = vrot.slane %v193_v40, 4 }
 0x1a0   :  { %v195_v42 = vadd.f32 %v194_v41, %v193_v40 }
 0x1a2   :  { %v196_v43 = vrot.slane %v195_v42, 2 }
 0x1a4   :  { %v197_v44 = vadd.f32 %v196_v43, %v195_v42 }
 0x1a6   :  { %v198_v45 = vrot.slane %v197_v44, 1 }
 0x1a8   :  { %v199_v46 = vadd.f32 %v198_v45, %v197_v44 }
 0x1aa   :  { %200 = vst.msk [vmem:[#allocation5] sm:$0x1] %vm188_vm4, %v199_v46 }
 0x1b1   :  { %v280_v47 = vld [vmem:[#allocation5] sm:$0x1] }
 0x1b2   :  { %343 = vlog2.f32 %v280_v47 }
 0x1bf   :  { %v344_v48 = vpop.eup %343 }
 0x1c0   :  { %v282_v49 = vmul.f32 0.6931472, %v344_v48 }
 0x1c2   :  { %v283_v51 = vadd.f32 %v282_v49, %v279_v50 }
 0x1c4   :  { %v285_v52 = vsel %vm188_vm4, %v283_v51, 0.0 }
 0x1c5   :  { %286 = vadd.xlane.f32.xlu0 %v285_v52 }
 0x208   :  { %v140_v53 = vpop.xlane.xlu1 %139 }
 0x209   :  { %145 = vst.msk [vmem:[#allocation2] sm:$0xff] %vm144_vm5, %v140_v53  ;;  %v146_v54 = vsub.f32 %v125_v24, %v140_v53 }
 0x20b   :  { %v147_v55 = vmul.f32 1.442695, %v146_v54 }
 0x20d   :  { %345 = vpow2.f32 %v147_v55 }
 0x210   :  { %v257_v62 = vld [vmem:[#allocation2] sm:$0xff] }
 0x21a   :  { %v346_v56 = vpop.eup %345 }
 0x21b   :  { %v149_v57 = vsel %vm137_vm3, %v346_v56, 0.0 }
 0x21c   :  { %150 = vadd.xlane.f32.xlu1 %v149_v57 }
 0x24e   :  { %v287_v1 = vpop.xlane.xlu0 %286 }
 0x24f   :  { %v288_v2 = vrot.slane %v287_v1, 4 }
 0x251   :  { %v289_v3 = vadd.f32 %v288_v2, %v287_v1 }
 0x253   :  { %v290_v4 = vrot.slane %v289_v3, 2 }
 0x255   :  { %v291_v8 = vadd.f32 %v290_v4, %v289_v3 }
 0x257   :  { %v292_v11 = vrot.slane %v291_v8, 1 }
 0x259   :  { %v293_v14 = vadd.f32 %v292_v11, %v291_v8 }
 0x2a5   :  { %v151_v58 = vpop.xlane.xlu1 %150 }
 0x2a6   :  { %152 = vst.msk [vmem:[#allocation3] sm:$0xff] %vm144_vm5, %v151_v58 }
 0x2ad   :  { %v258_v59 = vld [vmem:[#allocation3] sm:$0xff] }
 0x2ae   :  { %347 = vlog2.f32 %v258_v59 }
 0x2bb   :  { %v348_v60 = vpop.eup %347 }
 0x2bc   :  { %v260_v61 = vmul.f32 0.6931472, %v348_v60 }
 0x2be   :  { %v261_v63 = vadd.f32 %v260_v61, %v257_v62 }
 0x2c0   :  { %v263_v0 = vsel %vm144_vm5, %v261_v63, 0.0 }
 0x2c1   :  { %264 = vadd.xlane.f32.xlu1 %v263_v0 }
 0x34a   :  { %v265_v5 = vpop.xlane.xlu1 %264 }
 0x34b   :  { %v266_v6 = vrot.slane %v265_v5, 4 }
 0x34d   :  { %v267_v7 = vadd.f32 %v266_v6, %v265_v5 }
 0x34f   :  { %v268_v9 = vrot.slane %v267_v7, 2 }
 0x351   :  { %v269_v10 = vadd.f32 %v268_v9, %v267_v7 }
 0x353   :  { %v270_v12 = vrot.slane %v269_v10, 1 }
 0x355   :  { %v271_v13 = vadd.f32 %v270_v12, %v269_v10 }
 0x357   :  { %328 = vpush %v271_v13 }
 0x358   :  { %330 = vpush %v293_v14 }
 0x388   :  { %s329_s1 = spop %328 }
 0x389   :  { %v273_v16 = vstv %s329_s1  ;;  %s331_s19 = spop %330 }
 0x38a   :  { %v274_v17 = vadd.f32 %v273_v16, %v256_v15  ;;  %v296_v19 = vstv %s331_s19 }
 0x38c   :  { %276 = vst.msk [vmem:[#allocation6] sm:$0x1] %vm135_vm1, %v274_v17 }
 0x393   :  { %v295_v18 = vld [vmem:[#allocation6] sm:$0x1] }
 0x394   :  { %v297_v20 = vadd.f32 %v296_v19, %v295_v18 }
 0x396   :  { %v298_v21 = vmul.f32 0.125, %v297_v20 }
 0x398   :  { %300 = vst.msk [vmem:[#allocation12] sm:$0x1] %vm135_vm1, %v298_v21 }
 0x399   :  { %400 = shalt.err (!%p397_p0)
}
 0x39a   :  { %310 = dma.vmem_to_hbm [thread:$0]  %s308_s21, 16, %s464_s2, [#allocation9]  }
 0x39b   :  { %413 = dma.done.wait [#allocation9], 16  }
 0x39c   :  { %414 = vsyncadd [#allocation9], 4294967280 }
 0x39d   :  { %314 = vsyncpa [#allocation8], 1 }
 0x39e   :  { %315 = vsyncpa [#allocation11], 1 }
 0x39f   :  { %316 = vsyncpa [#allocation9], 1 }

</bundles_post_ra>
